<compile_context>
chip_gen: v5e
topology: v5e:2x2
jax: 0.10.0
libtpu: 0.0.40
codegen_flags: <defaults>
</compile_context>

<pallas_src>
import functools

import jax
import jax.numpy as jnp
from jax.experimental import pallas as pl
from jax.experimental.pallas import tpu as pltpu


def _round_up(x, m):
    return ((x + m - 1) // m) * m


def _pow_weight(one_minus, gamma):
    """(1 - p)**gamma.  Integer gamma -> repeated multiply (no EUP exp/log)."""
    g = float(gamma)
    if g == round(g) and 0 <= int(round(g)) <= 8:
        n = int(round(g))
        if n == 0:
            return jnp.ones_like(one_minus)
        out = one_minus
        for _ in range(n - 1):
            out = out * one_minus
        return out
    # Non-integer gamma: clamp so a marginally-negative base cannot NaN.
    return jnp.power(jnp.maximum(one_minus, 0.0), g)


def _per_column_focal(x, t, *, alpha, gamma, eps):
    """x: (C, TN) f32 logits, t: (1, TN) int32 targets -> (1, TN) f32 loss.

    Reference semantics (kornia one_hot adds eps everywhere):
        p_c   = softmax_c + eps
        focal = -alpha * (1 - p_c)^gamma * log(p_c)
        loss  = focal[target] + eps * sum_c focal[c]

    The target term is exact.  The eps-scaled tail uses log-softmax
    (one log per column instead of C); the difference is O(eps^2 / softmax).
    """
    m = jnp.max(x, axis=0, keepdims=True)                       # (1, TN)
    xs = x - m
    e = jnp.exp(xs)                                             # (C, TN)  EUP
    s = jnp.sum(e, axis=0, keepdims=True)                       # (1, TN)
    inv_s = 1.0 / s                                             # exact reciprocal
    p = e * inv_s + eps                                         # softmax + eps
    w = _pow_weight(1.0 - p, gamma)                             # (C, TN)

    # eps-scaled tail: sum_c w_c * log(softmax_c);  log-softmax = xs - log(s)
    log_sm = xs - jnp.log(s)                                    # one log per column
    tail = jnp.sum(w * log_sm, axis=0, keepdims=True)           # (1, TN)

    # exact target term
    cls = jax.lax.broadcasted_iota(jnp.int32, x.shape, 0)       # class id per sublane
    ind = cls == t                                              # (C, TN)
    p_t = jnp.sum(jnp.where(ind, p, 0.0), axis=0, keepdims=True)
    w_t = _pow_weight(1.0 - p_t, gamma)
    return (-alpha) * (w_t * jnp.log(p_t) + eps * tail)         # (1, TN)


def _focal_none_kernel(x_ref, t_ref, out_ref, *, alpha, gamma, eps):
    x = x_ref[...].astype(jnp.float32)
    out_ref[...] = _per_column_focal(x, t_ref[...], alpha=alpha, gamma=gamma,
                                     eps=eps)


def _focal_reduce_kernel(x_ref, t_ref, out_ref, acc_ref, *, alpha, gamma, eps,
                         n_valid, n_blocks, blocks_per_core, tn):
    c = pl.program_id(0)                       # core split (parallel)
    i = pl.program_id(1)                       # block loop (arbitrary / reduction)
    g = c * blocks_per_core + i                # global (unclamped) block index

    @pl.when(i == 0)
    def _init():
        acc_ref[...] = jnp.zeros_like(acc_ref)

    x = x_ref[...].astype(jnp.float32)
    loss_col = _per_column_focal(x, t_ref[...], alpha=alpha, gamma=gamma,
                                 eps=eps)                       # (1, tn)

    @pl.when(g < n_blocks - 1)                 # full in-range block: no mask
    def _full():
        acc_ref[...] += loss_col

    @pl.when(g == n_blocks - 1)                # last (possibly ragged) block
    def _last():
        col = (n_blocks - 1) * tn + jax.lax.broadcasted_iota(
            jnp.int32, loss_col.shape, 1)
        acc_ref[...] += jnp.where(col < n_valid, loss_col, 0.0)
    # g > n_blocks - 1 (odd block count, padded step of the 2nd core): skip.

    @pl.when(i == pl.num_programs(1) - 1)
    def _fini():
        out_ref[...] = jnp.sum(acc_ref[...]).reshape(1, 1, 1)


def focal_loss(x, target, *, alpha, gamma=2.0, num_class=10, reduction="mean",
               eps=1e-6, block_n=65536, transposed=False):
    """Focal loss forward.

    x:      (N, C) float logits (f32 or bf16), or (C, N) if transposed=True.
    target: (N,) integer class indices.
    """
    if x.ndim != 2:
        raise ValueError(f"Invalid input shape, we expect NxC. Got: {x.shape}")
    if transposed:
        C, N = x.shape
        xt = x                                  # caller already lane-dense (C, N)
    else:
        N, C = x.shape
        xt = x.T                                # one extra HBM pass (see TODO above)
    if C != num_class:
        raise ValueError("num_class must match the class dimension of x")

    t2d = target.astype(jnp.int32).reshape(1, N)

    # Lane tile: multiple of 128, large by default (amortize per-step overhead),
    # capped by the (rounded-up) batch size.  No host-side padding: partial last
    # blocks are handled in-kernel / by discarded out-of-range writes.
    tn = min(int(block_n), _round_up(N, 128))
    tn = _round_up(tn, 128)
    n_blocks = -(-N // tn)

    in_specs_1d = [
        pl.BlockSpec((C, tn), lambda i: (0, i)),
        pl.BlockSpec((1, tn), lambda i: (0, i)),
    ]

    if reduction == "none":
        kernel = functools.partial(
            _focal_none_kernel,
            alpha=float(alpha), gamma=float(gamma), eps=float(eps))
        out = pl.pallas_call(
            kernel,
            out_shape=jax.ShapeDtypeStruct((1, N), jnp.float32),
            grid=(n_blocks,),
            in_specs=in_specs_1d,
            out_specs=pl.BlockSpec((1, tn), lambda i: (0, i)),
            compiler_params=pltpu.CompilerParams(
                dimension_semantics=("parallel",),
                vmem_limit_bytes=32 * 1024 * 1024),
        )(xt, t2d)
        return out.reshape(N)

    if reduction in ("mean", "sum"):
        bpc = -(-n_blocks // 2)                 # blocks per core (2-way split)
        last = n_blocks - 1

        def blk_map(c, i):
            # clamp the padded step of the 2nd core (odd n_blocks) in range;
            # the kernel skips its contribution via the g >= n_blocks check.
            return (0, jnp.minimum(c * bpc + i, last))

        kernel = functools.partial(
            _focal_reduce_kernel,
            alpha=float(alpha), gamma=float(gamma), eps=float(eps),
            n_valid=N, n_blocks=n_blocks, blocks_per_core=bpc, tn=tn)
        partial_sums = pl.pallas_call(
            kernel,
            out_shape=jax.ShapeDtypeStruct((2, 1, 1), jnp.float32),
            grid=(2, bpc),
            in_specs=[
                pl.BlockSpec((C, tn), blk_map),
                pl.BlockSpec((1, tn), blk_map),
            ],
            out_specs=pl.BlockSpec((1, 1, 1), lambda c, i: (c, 0, 0)),
            scratch_shapes=[pltpu.VMEM((1, tn), jnp.float32)],
            compiler_params=pltpu.CompilerParams(
                dimension_semantics=("parallel", "arbitrary"),
                vmem_limit_bytes=32 * 1024 * 1024),
        )(xt, t2d)
        total = jnp.sum(partial_sums)           # combine the two per-core partials
        if reduction == "mean":
            total = total / N
        return total

    raise NotImplementedError(f"Invalid reduction mode: {reduction}")


def _focal_loss_ref(x, target, *, alpha, gamma, num_class, reduction, eps=1e-6):
    """Pure-JAX reference mirroring the PyTorch module."""
    x = x.astype(jnp.float32)
    p = jax.nn.softmax(x, axis=1) + eps
    one_hot = jax.nn.one_hot(target, num_class, dtype=jnp.float32) + eps
    weight = jnp.power(1.0 - p, gamma)
    focal = -alpha * weight * jnp.log(p)
    loss_tmp = jnp.sum(one_hot * focal, axis=1)
    if reduction == "none":
        return loss_tmp
    if reduction == "mean":
        return jnp.mean(loss_tmp)
    return jnp.sum(loss_tmp)


if __name__ == "__main__":
    key = jax.random.PRNGKey(0)
    alpha, gamma, C = 0.5, 2.0, 10
    failures = []

    def _check(name, out, ref):
        out = jnp.asarray(out, dtype=jnp.float32)
        ref = jnp.asarray(ref, dtype=jnp.float32)
        if not bool(jnp.allclose(out, ref, rtol=5e-3, atol=1e-5)):
            err = float(jnp.max(jnp.abs(out - ref)))
            failures.append(f"{name}: max_abs_err={err:.3e}")

    # Case 1: tiny batch, default config (single tile), all reductions.
    kx, kt = jax.random.split(jax.random.fold_in(key, 1))
    N = 8
    x = jax.random.normal(kx, (N, C), dtype=jnp.float32)
    tgt = jax.random.randint(kt, (N,), 0, C, dtype=jnp.int32)
    for red in ("none", "mean", "sum"):
        out = jax.block_until_ready(
            focal_loss(x, tgt, alpha=alpha, gamma=gamma, num_class=C,
                       reduction=red))
        ref = _focal_loss_ref(x, tgt, alpha=alpha, gamma=gamma, num_class=C,
                              reduction=red)
        _check(f"N=8/{red}", out, ref)

    # Case 2: multi-block grid (N not a tile multiple, small block_n override).
    kx, kt = jax.random.split(jax.random.fold_in(key, 2))
    N = 300
    x = jax.random.normal(kx, (N, C), dtype=jnp.float32)
    tgt = jax.random.randint(kt, (N,), 0, C, dtype=jnp.int32)
    for red in ("none", "mean", "sum"):
        out = jax.block_until_ready(
            focal_loss(x, tgt, alpha=alpha, gamma=gamma, num_class=C,
                       reduction=red, block_n=128))
        ref = _focal_loss_ref(x, tgt, alpha=alpha, gamma=gamma, num_class=C,
                              reduction=red)
        _check(f"N=300/{red}", out, ref)

    assert not failures, f"focal loss kernel mismatch vs reference: {failures}"
    print("KERNEL_OK")
</pallas_src>

<mosaic_0001>
module attributes {stable_mosaic.version = 11 : i64} {
  func.func @_focal_none_kernel(%arg0: i32, %arg1: memref<10x128xf32, #tpu.memory_space<vmem>>, %arg2: memref<1x128xi32, #tpu.memory_space<vmem>>, %arg3: memref<1x128xf32, #tpu.memory_space<vmem>>) attributes {dimension_semantics = [#tpu.dimension_semantics<parallel>], iteration_bounds = array<i64: 1>, scalar_prefetch = 0 : i64, scratch_operands = 0 : i64, tpu.core_type = #tpu.core_type<tc>, window_params = [{transform_indices = @transform_0, window_bounds = array<i64: 10, 128>}, {transform_indices = @transform_1, window_bounds = array<i64: 1, 128>}, {transform_indices = @transform_2, window_bounds = array<i64: 1, 128>}]} {
    %c0 = arith.constant 0 : index
    %c0_0 = arith.constant 0 : index
    %0 = vector.load %arg1[%c0, %c0_0] : memref<10x128xf32, #tpu.memory_space<vmem>>, vector<10x128xf32>
    %c0_1 = arith.constant 0 : index
    %c0_2 = arith.constant 0 : index
    %1 = vector.load %arg2[%c0_1, %c0_2] : memref<1x128xi32, #tpu.memory_space<vmem>>, vector<1x128xi32>
    %cst = arith.constant dense<0xFF800000> : vector<128xf32>
    %2 = vector.multi_reduction <maximumf>, %0, %cst [0] : vector<10x128xf32> to vector<128xf32>
    %3 = vector.shape_cast %2 : vector<128xf32> to vector<1x128xf32>
    %4 = vector.broadcast %3 : vector<1x128xf32> to vector<10x128xf32>
    %5 = arith.subf %0, %4 : vector<10x128xf32>
    %6 = math.exp %5 : vector<10x128xf32>
    %cst_3 = arith.constant dense<0.000000e+00> : vector<128xf32>
    %7 = vector.multi_reduction <add>, %6, %cst_3 [0] : vector<10x128xf32> to vector<128xf32>
    %8 = vector.shape_cast %7 : vector<128xf32> to vector<1x128xf32>
    %cst_4 = arith.constant 1.000000e+00 : f32
    %9 = vector.broadcast %cst_4 : f32 to vector<1x128xf32>
    %10 = arith.divf %9, %8 : vector<1x128xf32>
    %11 = vector.broadcast %10 : vector<1x128xf32> to vector<10x128xf32>
    %12 = arith.mulf %6, %11 : vector<10x128xf32>
    %cst_5 = arith.constant 9.99999997E-7 : f32
    %13 = vector.broadcast %cst_5 : f32 to vector<10x128xf32>
    %14 = arith.addf %12, %13 : vector<10x128xf32>
    %cst_6 = arith.constant 1.000000e+00 : f32
    %15 = vector.broadcast %cst_6 : f32 to vector<10x128xf32>
    %16 = arith.subf %15, %14 : vector<10x128xf32>
    %17 = arith.mulf %16, %16 : vector<10x128xf32>
    %18 = math.log %8 : vector<1x128xf32>
    %19 = vector.broadcast %18 : vector<1x128xf32> to vector<10x128xf32>
    %20 = arith.subf %5, %19 : vector<10x128xf32>
    %21 = arith.mulf %17, %20 : vector<10x128xf32>
    %cst_7 = arith.constant dense<0.000000e+00> : vector<128xf32>
    %22 = vector.multi_reduction <add>, %21, %cst_7 [0] : vector<10x128xf32> to vector<128xf32>
    %23 = vector.shape_cast %22 : vector<128xf32> to vector<1x128xf32>
    %24 = tpu.iota {dimensions = array<i32: 0>} : vector<10x128xi32>
    %25 = vector.broadcast %1 : vector<1x128xi32> to vector<10x128xi32>
    %26 = arith.cmpi eq, %24, %25 : vector<10x128xi32>
    %cst_8 = arith.constant 0.000000e+00 : f32
    %27 = vector.broadcast %cst_8 : f32 to vector<10x128xf32>
    %28 = arith.select %26, %14, %27 : vector<10x128xi1>, vector<10x128xf32>
    %cst_9 = arith.constant dense<0.000000e+00> : vector<128xf32>
    %29 = vector.multi_reduction <add>, %28, %cst_9 [0] : vector<10x128xf32> to vector<128xf32>
    %30 = vector.shape_cast %29 : vector<128xf32> to vector<1x128xf32>
    %cst_10 = arith.constant 1.000000e+00 : f32
    %31 = vector.broadcast %cst_10 : f32 to vector<1x128xf32>
    %32 = arith.subf %31, %30 : vector<1x128xf32>
    %33 = arith.mulf %32, %32 : vector<1x128xf32>
    %34 = math.log %30 : vector<1x128xf32>
    %35 = arith.mulf %33, %34 : vector<1x128xf32>
    %cst_11 = arith.constant 9.99999997E-7 : f32
    %36 = vector.broadcast %cst_11 : f32 to vector<1x128xf32>
    %37 = arith.mulf %36, %23 : vector<1x128xf32>
    %38 = arith.addf %35, %37 : vector<1x128xf32>
    %cst_12 = arith.constant -5.000000e-01 : f32
    %39 = vector.broadcast %cst_12 : f32 to vector<1x128xf32>
    %40 = arith.mulf %39, %38 : vector<1x128xf32>
    %c0_13 = arith.constant 0 : index
    %c0_14 = arith.constant 0 : index
    %41 = vector.load %arg3[%c0_13, %c0_14] : memref<1x128xf32, #tpu.memory_space<vmem>>, vector<1x128xf32>
    tpu.vector_store %arg3[%c0_13, %c0_14], %40 {strides = array<i32>} : memref<1x128xf32, #tpu.memory_space<vmem>>, vector<1x128xf32>,
    return
  }
  func.func @transform_0(%arg0: i32) -> (i32, i32) {
    %c0_i32 = arith.constant 0 : i32
    %c0_i32_0 = arith.constant 0 : i32
    return %c0_i32, %arg0 : i32, i32
  }
  func.func @transform_1(%arg0: i32) -> (i32, i32) {
    %c0_i32 = arith.constant 0 : i32
    %c0_i32_0 = arith.constant 0 : i32
    return %c0_i32, %arg0 : i32, i32
  }
  func.func @transform_2(%arg0: i32) -> (i32, i32) {
    %c0_i32 = arith.constant 0 : i32
    %c0_i32_0 = arith.constant 0 : i32
    return %c0_i32, %arg0 : i32, i32
  }
}

</mosaic_0001>

<bundles_post_ra>
// kernel: tpu_custom_call.1
= control target key start
LH: loop header
LB: loop body
LE: loop exit
PB: predicated region body
PF: predicated region fallthrough
CT: control target
= control target key end

     0   :  { %vm15_vm0 = vcmask 1041408   ;;  %s186_s0 = inlined_call_operand.vmem [shape: f32[10,8], index: 0, kind: input, shape index: {}]   ;;  %s187_s1 = inlined_call_operand.vmem [shape: s32[1,8], index: 1, kind: input, shape index: {}]   ;;  %s188_s2 = inlined_call_operand.hbm [shape: f32[1,8], index: 2, kind: output, shape index: {}]  }
   0x1   :  { %v12_v0 = vld [vmem:[%s186_s0] sm:$0xff]  ;;  %v13_v1 = vld [vmem:[%s186_s0 + $0x8] sm:$0x3] }
   0x2   :  { %v16_v2 = vsel %vm15_vm0, %v13_v1, -inf }
   0x3   :  { %7 = vsyncpa [#allocation3], 0  ;;  %v17_v3 = vmax.f32 %v12_v0, %v16_v2  ;;  %v75_v25 = vlaneseq  ;;  %v117_v36 = vld [vmem:[%s187_s1] ss:$0 sm:$0xff]  ;;  %s154_s1 = smov [#allocation2]   ;;  %s107_s17 = sshll.u32 %s188_s2, 4  ;;  %s108_s17 = int_to_ptr.hbm [resolvable:$true] %s107_s17 }
   0x4   :  { %s105_s14 = sshll.u32 %s154_s1, 4  ;;  %s106_s14 = int_to_ptr.vmem [resolvable:$true] %s105_s14 }
   0x5   :  { %v18_v4 = vrot.slane %v17_v3, 4  ;;  %v76_v30 = vshrl.u32 %v75_v25, 7 }
   0x7   :  { %v19_v5 = vmax.f32 %v17_v3, %v18_v4  ;;  %v77_v35 = vadd.s32 8, %v76_v30  ;;  %vm79_vm5 = vcmp.eq.s32.totalorder %v76_v30, %v117_v36 }
   0x9   :  { %v20_v6 = vrot.slane %v19_v5, 2  ;;  %vm80_vm6 = vcmp.eq.s32.totalorder %v77_v35, %v117_v36 }
   0xb   :  { %v21_v7 = vmax.f32 %v19_v5, %v20_v6 }
   0xd   :  { %v22_v8 = vrot.slane %v21_v7, 1 }
   0xf   :  { %v23_v9 = vmax.f32 %v21_v7, %v22_v8 }
  0x11   :  { %v24_v10 = vsub.f32 %v12_v0, %v23_v9  ;;  %v25_v11 = vsub.f32 %v13_v1, %v23_v9 }
  0x13   :  { %v26_v12 = vmul.f32 1.442695, %v24_v10  ;;  %v28_v13 = vmul.f32 1.442695, %v25_v11 }
  0x15   :  { %118 = vpow2.f32 %v26_v12 }
  0x16   :  { %120 = vpow2.f32 %v28_v13 }
  0x1b   :  { %v119_v14 = vpop.eup %118 }
  0x1c   :  { %v121_v15 = vpop.eup %120 }
  0x1d   :  { %v30_v16 = vsel %vm15_vm0, %v121_v15, 0.0 }
  0x1e   :  { %v31_v17 = vadd.f32 %v119_v14, %v30_v16 }
  0x20   :  { %v32_v18 = vrot.slane %v31_v17, 4 }
  0x22   :  { %v33_v19 = vadd.f32 %v32_v18, %v31_v17 }
  0x24   :  { %v34_v20 = vrot.slane %v33_v19, 2 }
  0x26   :  { %v35_v21 = vadd.f32 %v34_v20, %v33_v19 }
  0x28   :  { %v36_v22 = vrot.slane %v35_v21, 1 }
  0x2a   :  { %v37_v23 = vadd.f32 %v36_v22, %v35_v21 }
  0x2c   :  { %122 = vrcp.f32 %v37_v23  ;;  %v49_v27 = vand.u32 2147483648, %v37_v23  ;;  %vm43_vm1 = vweird.f32 %v37_v23  ;;  %v47_v29 = vand.u32 2147483647, %v37_v23 }
  0x2d   :  { %124 = vlog2.f32 %v37_v23 }
  0x2e   :  { %v50_v32 = vor.u32 1.1754944e-38, %v49_v27  ;;  %vm48_vm4 = vcmp.eq.f32.partialorder %v47_v29, 8.507059e+37 }
  0x32   :  { %v123_v24 = vpop.eup %122 }
  0x33   :  { %v39_v26 = vmul.f32 %v123_v24, %v37_v23  ;;  %vm44_vm2 = vweird.f32 %v123_v24  ;;  %v125_v33 = vpop.eup %124 }
  0x34   :  { %vm45_vm3 = vmor %vm43_vm1, %vm44_vm2  ;;  %v62_v39 = vmul.f32 0.6931472, %v125_v33 }
  0x35   :  { %v40_v28 = vsub.f32 1.0, %v39_v26 }
  0x36   :  { %v63_v44 = vsub.f32 %v24_v10, %v62_v39  ;;  %v64_v45 = vsub.f32 %v25_v11, %v62_v39 }
  0x37   :  { %v41_v31 = vmul.f32 %v123_v24, %v40_v28 }
  0x39   :  { %v42_v34 = vadd.f32 %v123_v24, %v41_v31 }
  0x3b   :  { %v46_v37 = vsel %vm45_vm3, %v123_v24, %v42_v34 }
  0x3c   :  { %v51_v38 = vsel %vm48_vm4, %v50_v32, %v46_v37 }
  0x3d   :  { %v53_v40 = vmul.f32 %v119_v14, %v51_v38  ;;  %v54_v41 = vmul.f32 %v121_v15, %v51_v38 }
  0x3f   :  { %v55_v42 = vadd.f32 1e-06, %v53_v40  ;;  %v56_v43 = vadd.f32 1e-06, %v54_v41 }
  0x41   :  { %v57_v46 = vsub.f32 1.0, %v55_v42  ;;  %v58_v47 = vsub.f32 1.0, %v56_v43  ;;  %v81_v48 = vsel %vm79_vm5, %v55_v42, 0.0  ;;  %v82_v49 = vsel %vm80_vm6, %v56_v43, 0.0 }
  0x42   :  { %v83_v50 = vsel %vm15_vm0, %v82_v49, 0.0 }
  0x43   :  { %v59_v51 = vmul.f32 %v57_v46, %v57_v46  ;;  %v60_v52 = vmul.f32 %v58_v47, %v58_v47  ;;  %v84_v53 = vadd.f32 %v83_v50, %v81_v48 }
  0x45   :  { %v65_v54 = vmul.f32 %v63_v44, %v59_v51  ;;  %v66_v55 = vmul.f32 %v64_v45, %v60_v52  ;;  %v85_v56 = vrot.slane %v84_v53, 4 }
  0x47   :  { %v67_v57 = vsel %vm15_vm0, %v66_v55, 0.0  ;;  %v86_v58 = vadd.f32 %v85_v56, %v84_v53 }
  0x48   :  { %v68_v59 = vadd.f32 %v67_v57, %v65_v54 }
  0x49   :  { %v87_v60 = vrot.slane %v86_v58, 2 }
  0x4a   :  { %v69_v61 = vrot.slane %v68_v59, 4 }
  0x4b   :  { %v88_v62 = vadd.f32 %v87_v60, %v86_v58 }
  0x4c   :  { %v70_v63 = vadd.f32 %v69_v61, %v68_v59 }
  0x4d   :  { %v89_v0 = vrot.slane %v88_v62, 1 }
  0x4e   :  { %v71_v1 = vrot.slane %v70_v63, 2 }
  0x4f   :  { %v90_v2 = vadd.f32 %v89_v0, %v88_v62 }
  0x50   :  { %v72_v3 = vadd.f32 %v71_v1, %v70_v63 }
  0x51   :  { %126 = vlog2.f32 %v90_v2  ;;  %v91_v5 = vsub.f32 1.0, %v90_v2 }
  0x52   :  { %v73_v4 = vrot.slane %v72_v3, 1 }
  0x53   :  { %v92_v7 = vmul.f32 %v91_v5, %v91_v5 }
  0x54   :  { %v74_v6 = vadd.f32 %v73_v4, %v72_v3 }
  0x56   :  { %v96_v10 = vmul.f32 1e-06, %v74_v6 }
  0x57   :  { %v127_v8 = vpop.eup %126 }
  0x58   :  { %v94_v9 = vmul.f32 0.6931472, %v127_v8 }
  0x5a   :  { %v95_v11 = vmul.f32 %v94_v9, %v92_v7 }
  0x5c   :  { %v97_v12 = vadd.f32 %v96_v10, %v95_v11 }
  0x5e   :  { %v98_v13 = vmul.f32 -0.5, %v97_v12 }
  0x60   :  { %99 = vst [vmem:[#allocation2] sm:$0x1] %v98_v13 }
  0x61   :  { %110 = dma.vmem_to_hbm [thread:$0]  %s106_s14, 16, %s108_s17, [#allocation3]  }
  0x62   :  { %152 = dma.done.wait [#allocation3], 16  }
  0x63   :  { %153 = vsyncadd [#allocation3], 4294967280 }
  0x64   :  { %115 = vsyncpa [#allocation3], 1 }

</bundles_post_ra>
